<compile_context>
chip_gen: v5e
topology: v5e:2x2
jax: 0.10.0
libtpu: 0.0.40
codegen_flags: <defaults>
</compile_context>

<pallas_src>
import jax
import jax.numpy as jnp
from jax import lax
from jax.experimental import pallas as pl
from jax.experimental.pallas import tpu as pltpu

EPS = 1e-6
_LANES = 128
_NEG_BIG = -1e30      # sigmoid(_NEG_BIG) == 0 exactly -> neutral pad (S < 128 only)


# ----------------------------------------------------------------------------- kernel
def _make_dice_kernel(ts, tail_cols, k_total, kps, needs_guard, unroll):
    """Builds the kernel, closing over static tiling parameters.

    ts          : lane width of a full spatial tile (multiple of 128)
    tail_cols   : valid lanes in the last (flat) spatial tile, 1..ts
    k_total     : total number of flat spatial tiles
    kps         : spatial tiles handled per P-split
    needs_guard : True if P * kps > k_total (one redundant, skipped grid step)
    """
    n_full = ts // _LANES
    tail_full = tail_cols // _LANES
    tail_rem = tail_cols % _LANES
    needs_mask = tail_cols != ts

    def _accum(x_ref, t_ref, n_slices, carry):
        # Fused per-128-lane-slice loop: no full-tile f32 temporaries.
        if n_slices == 0:
            return carry

        def body(i, c):
            inter, card = c
            off = pl.multiple_of(i * _LANES, _LANES)
            x = x_ref[:, pl.ds(off, _LANES)].astype(jnp.float32)
            t = t_ref[:, pl.ds(off, _LANES)].astype(jnp.float32)
            s = 1.0 / (1.0 + jnp.exp(-x))          # sigmoid; exact 0 for -1e30 pad
            return inter + s * t, card + (s + t)

        return lax.fori_loop(0, n_slices, body, carry,
                             unroll=max(1, min(unroll, n_slices)))

    def kernel(x_ref, t_ref, inter_ref, card_ref):
        p = pl.program_id(0)
        k = pl.program_id(2)
        flat_k = p * kps + k                        # flat spatial-tile index

        @pl.when(k == 0)
        def _():
            inter_ref[...] = jnp.zeros_like(inter_ref)
            card_ref[...] = jnp.zeros_like(card_ref)

        zeros = (jnp.zeros(inter_ref.shape, jnp.float32),
                 jnp.zeros(card_ref.shape, jnp.float32))

        def full_tile():
            inter, card = _accum(x_ref, t_ref, n_full, zeros)
            inter_ref[...] += inter
            card_ref[...] += card

        def tail_tile():
            # Last flat spatial tile: only `tail_cols` lanes are valid.
            inter, card = _accum(x_ref, t_ref, tail_full, zeros)
            if tail_rem:
                off = tail_full * _LANES            # static offset
                x = x_ref[:, off:off + _LANES].astype(jnp.float32)
                t = t_ref[:, off:off + _LANES].astype(jnp.float32)
                s = 1.0 / (1.0 + jnp.exp(-x))
                lane = lax.broadcasted_iota(jnp.int32, x.shape, 1)
                valid = lane < tail_rem             # static mask, only on last tile
                inter = inter + jnp.where(valid, s * t, 0.0)
                card = card + jnp.where(valid, s + t, 0.0)
            inter_ref[...] += inter
            card_ref[...] += card

        if not needs_mask and not needs_guard:
            full_tile()
        else:
            last = k_total - 1
            full_cond = (flat_k < last) if needs_mask else (flat_k <= last)
            pl.when(full_cond)(full_tile)
            if needs_mask:
                pl.when(flat_k == last)(tail_tile)
            # flat_k > last (needs_guard): redundant clamped step, nothing added.

    return kernel


# ----------------------------------------------------------------------------- tiling
def _hw_budgets():
    """(per-input-tile byte target, vmem_limit_bytes) by TPU generation."""
    try:
        vmem = int(getattr(pltpu.get_tpu_info(), "vmem_capacity_bytes", 0))
    except Exception:
        vmem = 0
    if vmem <= 0:
        vmem = 64 * 1024 * 1024                    # unknown -> assume smaller VMEM
    if vmem <= 96 * 1024 * 1024:                   # v7x-class: 64 MiB VMEM per TC
        return 4 * 1024 * 1024, 48 * 1024 * 1024
    return 8 * 1024 * 1024, 64 * 1024 * 1024       # v5e / v6e: 128 MiB VMEM


def _row_tile(rows, itemsize):
    # Sublane quantum that keeps vregs fully packed: 8 f32 / 16 bf16 / 32 int8 rows.
    q = {1: 32, 2: 16}.get(itemsize, 8)
    if rows % q == 0:
        return q
    if rows % 8 == 0:
        return 8
    return rows if rows <= 64 else 64              # full-dim block, or edge-masked


def _choose_tiles(rows, s, itemsize, target_bytes):
    """Pick (tr, ts): ts multiple of 128, tr*ts*itemsize <= target_bytes."""
    s_aligned = (s // _LANES) * _LANES             # caller guarantees s >= 128
    tr = _row_tile(rows, itemsize)
    ts = (target_bytes // (tr * itemsize)) // _LANES * _LANES
    ts = max(_LANES, min(s_aligned, ts))
    if ts == s_aligned:                            # spatial capped the tile:
        while (rows % (tr * 2) == 0 and tr * 2 <= 64      # grow the row tile
               and tr * 2 * ts * itemsize <= target_bytes):
            tr *= 2
    return tr, ts


# ----------------------------------------------------------------------------- wrapper
def batch_dice_loss(inp, tgt, *, tile_bytes=None):
    """Pallas-TPU BatchDiceLoss forward.  inp/tgt: (N, C, *spatial), same shape."""
    if inp.shape != tgt.shape:
        raise ValueError(
            "input and target shapes must be the same. Got: Input:{} Target:{}".format(
                inp.shape, tgt.shape))

    n, c = int(inp.shape[0]), int(inp.shape[1])
    s = 1
    for d in inp.shape[2:]:
        s *= int(d)
    rows = n * c

    x = inp.reshape(rows, s)                       # free, contiguous view of NCHW
    t = tgt.reshape(rows, s)

    # Tiny-spatial fallback only: pad to one 128-lane slice with neutral values.
    if s < _LANES:
        pad = _LANES - s
        x = jnp.pad(x, ((0, 0), (0, pad)), constant_values=_NEG_BIG)
        t = jnp.pad(t, ((0, 0), (0, pad)))
        s = _LANES

    itemsize = max(jnp.dtype(x.dtype).itemsize, jnp.dtype(t.dtype).itemsize)
    target_bytes, vmem_limit = _hw_budgets()
    if tile_bytes is not None:
        target_bytes = int(tile_bytes)

    tr, ts = _choose_tiles(rows, s, itemsize, target_bytes)
    grid_r = pl.cdiv(rows, tr)
    k_total = pl.cdiv(s, ts)
    tail_cols = s - (k_total - 1) * ts             # valid lanes in last spatial tile

    # Guarantee >=2 "parallel" tiles for v7x's two TensorCores: if there is only
    # one row tile, split the spatial reduction into two independent partials.
    p_split = 2 if (grid_r == 1 and k_total >= 2) else 1
    kps = pl.cdiv(k_total, p_split)
    needs_guard = p_split * kps > k_total          # one redundant (skipped) step

    def in_index_map(p, r, k):
        flat = p * kps + k
        if needs_guard:
            flat = jnp.minimum(flat, k_total - 1)  # clamp the single OOB step
        return (r, flat)

    unroll = 8 if tr <= 16 else (4 if tr <= 32 else 1)
    kernel = _make_dice_kernel(ts, tail_cols, k_total, kps, needs_guard, unroll)

    acc_shape = jax.ShapeDtypeStruct((p_split, rows, _LANES), jnp.float32)
    acc_spec = pl.BlockSpec((None, tr, _LANES), lambda p, r, k: (p, r, 0))

    inter_p, card_p = pl.pallas_call(
        kernel,
        out_shape=(acc_shape, acc_shape),
        grid_spec=pltpu.PrefetchScalarGridSpec(
            num_scalar_prefetch=0,
            grid=(p_split, grid_r, kps),
            in_specs=[
                pl.BlockSpec((tr, ts), in_index_map),
                pl.BlockSpec((tr, ts), in_index_map),
            ],
            out_specs=[acc_spec, acc_spec],
        ),
        compiler_params=pltpu.CompilerParams(
            dimension_semantics=("parallel", "parallel", "arbitrary"),
            vmem_limit_bytes=vmem_limit,
        ),
    )(x, t)

    inter = jnp.sum(inter_p, axis=(0, 2))          # (N*C,)
    card = jnp.sum(card_p, axis=(0, 2))            # (N*C,)
    dice = 2.0 * inter / (card + EPS)
    # sum_j mean_n(1 - dice[n, j]) / C  ==  mean over all (n, j): every weight == 1
    return jnp.mean(1.0 - dice)


# ----------------------------------------------------------------------------- checks
def _reference_loss(inp, tgt):
    # Pure-JAX mirror of the PyTorch forward.
    sig = jax.nn.sigmoid(inp.astype(jnp.float32))
    t = tgt.astype(jnp.float32)
    axes = tuple(range(2, inp.ndim))
    inter = jnp.sum(sig * t, axis=axes)            # (N, C)
    card = jnp.sum(sig + t, axis=axes)             # (N, C)
    dice = 2.0 * inter / (card + EPS)
    per_channel = jnp.mean(1.0 - dice, axis=0)     # mean over batch, per channel
    return jnp.sum(per_channel) / inp.shape[1]     # sum over channels / C


if __name__ == "__main__":
    key = jax.random.PRNGKey(0)
    k1, k2, k3, k4, k5, k6 = jax.random.split(key, 6)

    # 1) Basic NCHW shape (S = 256), default tiling -> single grid step.
    x1 = jax.random.normal(k1, (2, 4, 16, 16), dtype=jnp.float32)
    t1 = (jax.random.uniform(k2, (2, 4, 16, 16)) > 0.5).astype(jnp.float32)
    out1 = jax.block_until_ready(batch_dice_loss(x1, t1))
    ref1 = _reference_loss(x1, t1)
    assert jnp.allclose(out1, ref1, atol=1e-5, rtol=1e-4), (out1, ref1)

    # 2) Non-128-multiple spatial size (S = 720) with a forced small tile:
    #    exercises multi-tile accumulation, the in-kernel tail mask, the 2-way
    #    TensorCore split, and the clamped/guarded redundant step.
    x2 = jax.random.normal(k3, (2, 4, 24, 30), dtype=jnp.float32)
    t2 = (jax.random.uniform(k4, (2, 4, 24, 30)) > 0.5).astype(jnp.float32)
    out2 = jax.block_until_ready(batch_dice_loss(x2, t2, tile_bytes=8 * 1024))
    ref2 = _reference_loss(x2, t2)
    assert jnp.allclose(out2, ref2, atol=1e-5, rtol=1e-4), (out2, ref2)

    # 3) bf16 inputs (per-128-lane-slice upcast path), default tiling.
    x3 = jax.random.normal(k5, (2, 4, 64, 80), dtype=jnp.bfloat16)
    t3 = (jax.random.uniform(k6, (2, 4, 64, 80)) > 0.5).astype(jnp.bfloat16)
    out3 = jax.block_until_ready(batch_dice_loss(x3, t3))
    ref3 = _reference_loss(x3, t3)
    assert jnp.allclose(out3, ref3, atol=1e-4, rtol=1e-3), (out3, ref3)

    # 4) Tiny spatial extent (S = 64 < 128): neutral-pad fallback path.
    x4 = jax.random.normal(k1, (2, 4, 8, 8), dtype=jnp.float32)
    t4 = (jax.random.uniform(k2, (2, 4, 8, 8)) > 0.5).astype(jnp.float32)
    out4 = jax.block_until_ready(batch_dice_loss(x4, t4))
    ref4 = _reference_loss(x4, t4)
    assert jnp.allclose(out4, ref4, atol=1e-5, rtol=1e-4), (out4, ref4)

    print("KERNEL_OK")
</pallas_src>

<mosaic_0001>
module attributes {stable_mosaic.version = 11 : i64} {
  func.func @kernel(%arg0: i32, %arg1: i32, %arg2: i32, %arg3: memref<8x256xf32, #tpu.memory_space<vmem>>, %arg4: memref<8x256xf32, #tpu.memory_space<vmem>>, %arg5: memref<1x8x128xf32, #tpu.memory_space<vmem>>, %arg6: memref<1x8x128xf32, #tpu.memory_space<vmem>>) attributes {dimension_semantics = [#tpu.dimension_semantics<parallel>, #tpu.dimension_semantics<parallel>, #tpu.dimension_semantics<arbitrary>], iteration_bounds = array<i64: 1, 1, 1>, scalar_prefetch = 0 : i64, scratch_operands = 0 : i64, tpu.core_type = #tpu.core_type<tc>, window_params = [{transform_indices = @transform_0, window_bounds = array<i64: 8, 256>}, {transform_indices = @transform_1, window_bounds = array<i64: 8, 256>}, {transform_indices = @transform_2, window_bounds = array<i64: 1, 8, 128>}, {transform_indices = @transform_3, window_bounds = array<i64: 1, 8, 128>}]} {
    %c0_i32 = arith.constant 0 : i32
    %0 = arith.cmpi eq, %arg2, %c0_i32 : i32
    %1 = arith.extui %0 : i1 to i32
    %c0_i32_0 = arith.constant 0 : i32
    %2 = arith.cmpi ne, %1, %c0_i32_0 : i32
    scf.if %2 {
      %cst_25 = arith.constant 0.000000e+00 : f32
      %51 = vector.broadcast %cst_25 : f32 to vector<8x128xf32>
      %c0_26 = arith.constant 0 : index
      %c0_27 = arith.constant 0 : index
      %c0_28 = arith.constant 0 : index
      %52 = vector.load %arg5[%c0_26, %c0_27, %c0_28] : memref<1x8x128xf32, #tpu.memory_space<vmem>>, vector<1x8x128xf32>
      %53 = vector.shape_cast %52 : vector<1x8x128xf32> to vector<8x128xf32>
      %54 = vector.shape_cast %51 : vector<8x128xf32> to vector<1x8x128xf32>
      tpu.vector_store %arg5[%c0_26, %c0_27, %c0_28], %54 {strides = array<i32>} : memref<1x8x128xf32, #tpu.memory_space<vmem>>, vector<1x8x128xf32>,
      %cst_29 = arith.constant 0.000000e+00 : f32
      %55 = vector.broadcast %cst_29 : f32 to vector<8x128xf32>
      %c0_30 = arith.constant 0 : index
      %c0_31 = arith.constant 0 : index
      %c0_32 = arith.constant 0 : index
      %56 = vector.load %arg6[%c0_30, %c0_31, %c0_32] : memref<1x8x128xf32, #tpu.memory_space<vmem>>, vector<1x8x128xf32>
      %57 = vector.shape_cast %56 : vector<1x8x128xf32> to vector<8x128xf32>
      %58 = vector.shape_cast %55 : vector<8x128xf32> to vector<1x8x128xf32>
      tpu.vector_store %arg6[%c0_30, %c0_31, %c0_32], %58 {strides = array<i32>} : memref<1x8x128xf32, #tpu.memory_space<vmem>>, vector<1x8x128xf32>,
    } else {
    }
    %cst = arith.constant 0.000000e+00 : f32
    %3 = vector.broadcast %cst : f32 to vector<8x128xf32>
    %cst_1 = arith.constant 0.000000e+00 : f32
    %4 = vector.broadcast %cst_1 : f32 to vector<8x128xf32>
    %c0_i32_2 = arith.constant 0 : i32
    %c128_i32 = arith.constant 128 : i32
    %5 = arith.muli %c0_i32_2, %c128_i32 : i32
    %6 = tpu.assume_multiple %5, 128 : i32
    %c0 = arith.constant 0 : index
    %7 = arith.index_cast %6 : i32 to index
    %8 = vector.load %arg3[%c0, %7] : memref<8x256xf32, #tpu.memory_space<vmem>>, vector<8x128xf32>
    %c0_3 = arith.constant 0 : index
    %9 = arith.index_cast %6 : i32 to index
    %10 = vector.load %arg4[%c0_3, %9] : memref<8x256xf32, #tpu.memory_space<vmem>>, vector<8x128xf32>
    %cst_4 = arith.constant 0.000000e+00 : f32
    %11 = vector.broadcast %cst_4 : f32 to vector<8x128xf32>
    %12 = arith.subf %11, %8 : vector<8x128xf32>
    %13 = math.exp %12 : vector<8x128xf32>
    %cst_5 = arith.constant 1.000000e+00 : f32
    %14 = vector.broadcast %cst_5 : f32 to vector<8x128xf32>
    %15 = arith.addf %14, %13 : vector<8x128xf32>
    %cst_6 = arith.constant 1.000000e+00 : f32
    %16 = vector.broadcast %cst_6 : f32 to vector<8x128xf32>
    %17 = arith.divf %16, %15 : vector<8x128xf32>
    %18 = arith.mulf %17, %10 : vector<8x128xf32>
    %19 = arith.addf %3, %18 : vector<8x128xf32>
    %20 = arith.addf %17, %10 : vector<8x128xf32>
    %21 = arith.addf %4, %20 : vector<8x128xf32>
    %c1_i32 = arith.constant 1 : i32
    %c128_i32_7 = arith.constant 128 : i32
    %22 = arith.muli %c1_i32, %c128_i32_7 : i32
    %23 = tpu.assume_multiple %22, 128 : i32
    %c0_8 = arith.constant 0 : index
    %24 = arith.index_cast %23 : i32 to index
    %25 = vector.load %arg3[%c0_8, %24] : memref<8x256xf32, #tpu.memory_space<vmem>>, vector<8x128xf32>
    %c0_9 = arith.constant 0 : index
    %26 = arith.index_cast %23 : i32 to index
    %27 = vector.load %arg4[%c0_9, %26] : memref<8x256xf32, #tpu.memory_space<vmem>>, vector<8x128xf32>
    %cst_10 = arith.constant 0.000000e+00 : f32
    %28 = vector.broadcast %cst_10 : f32 to vector<8x128xf32>
    %29 = arith.subf %28, %25 : vector<8x128xf32>
    %30 = math.exp %29 : vector<8x128xf32>
    %cst_11 = arith.constant 1.000000e+00 : f32
    %31 = vector.broadcast %cst_11 : f32 to vector<8x128xf32>
    %32 = arith.addf %31, %30 : vector<8x128xf32>
    %cst_12 = arith.constant 1.000000e+00 : f32
    %33 = vector.broadcast %cst_12 : f32 to vector<8x128xf32>
    %34 = arith.divf %33, %32 : vector<8x128xf32>
    %35 = arith.mulf %34, %27 : vector<8x128xf32>
    %36 = arith.addf %19, %35 : vector<8x128xf32>
    %37 = arith.addf %34, %27 : vector<8x128xf32>
    %38 = arith.addf %21, %37 : vector<8x128xf32>
    %c2_i32 = arith.constant 2 : i32
    %c0_13 = arith.constant 0 : index
    %c0_14 = arith.constant 0 : index
    %c0_15 = arith.constant 0 : index
    %39 = vector.load %arg5[%c0_13, %c0_14, %c0_15] : memref<1x8x128xf32, #tpu.memory_space<vmem>>, vector<1x8x128xf32>
    %40 = vector.shape_cast %39 : vector<1x8x128xf32> to vector<8x128xf32>
    %41 = arith.addf %40, %36 : vector<8x128xf32>
    %c0_16 = arith.constant 0 : index
    %c0_17 = arith.constant 0 : index
    %c0_18 = arith.constant 0 : index
    %42 = vector.load %arg5[%c0_16, %c0_17, %c0_18] : memref<1x8x128xf32, #tpu.memory_space<vmem>>, vector<1x8x128xf32>
    %43 = vector.shape_cast %42 : vector<1x8x128xf32> to vector<8x128xf32>
    %44 = vector.shape_cast %41 : vector<8x128xf32> to vector<1x8x128xf32>
    tpu.vector_store %arg5[%c0_16, %c0_17, %c0_18], %44 {strides = array<i32>} : memref<1x8x128xf32, #tpu.memory_space<vmem>>, vector<1x8x128xf32>,
    %c0_19 = arith.constant 0 : index
    %c0_20 = arith.constant 0 : index
    %c0_21 = arith.constant 0 : index
    %45 = vector.load %arg6[%c0_19, %c0_20, %c0_21] : memref<1x8x128xf32, #tpu.memory_space<vmem>>, vector<1x8x128xf32>
    %46 = vector.shape_cast %45 : vector<1x8x128xf32> to vector<8x128xf32>
    %47 = arith.addf %46, %38 : vector<8x128xf32>
    %c0_22 = arith.constant 0 : index
    %c0_23 = arith.constant 0 : index
    %c0_24 = arith.constant 0 : index
    %48 = vector.load %arg6[%c0_22, %c0_23, %c0_24] : memref<1x8x128xf32, #tpu.memory_space<vmem>>, vector<1x8x128xf32>
    %49 = vector.shape_cast %48 : vector<1x8x128xf32> to vector<8x128xf32>
    %50 = vector.shape_cast %47 : vector<8x128xf32> to vector<1x8x128xf32>
    tpu.vector_store %arg6[%c0_22, %c0_23, %c0_24], %50 {strides = array<i32>} : memref<1x8x128xf32, #tpu.memory_space<vmem>>, vector<1x8x128xf32>,
    return
  }
  func.func @transform_0(%arg0: i32, %arg1: i32, %arg2: i32) -> (i32, i32) {
    %c1_i32 = arith.constant 1 : i32
    %0 = arith.muli %arg0, %c1_i32 : i32
    %1 = arith.addi %0, %arg2 : i32
    %c0_i32 = arith.constant 0 : i32
    return %arg1, %1 : i32, i32
  }
  func.func @transform_1(%arg0: i32, %arg1: i32, %arg2: i32) -> (i32, i32) {
    %c1_i32 = arith.constant 1 : i32
    %0 = arith.muli %arg0, %c1_i32 : i32
    %1 = arith.addi %0, %arg2 : i32
    %c0_i32 = arith.constant 0 : i32
    return %arg1, %1 : i32, i32
  }
  func.func @transform_2(%arg0: i32, %arg1: i32, %arg2: i32) -> (i32, i32, i32) {
    %c0_i32 = arith.constant 0 : i32
    %c0_i32_0 = arith.constant 0 : i32
    return %arg0, %arg1, %c0_i32 : i32, i32, i32
  }
  func.func @transform_3(%arg0: i32, %arg1: i32, %arg2: i32) -> (i32, i32, i32) {
    %c0_i32 = arith.constant 0 : i32
    %c0_i32_0 = arith.constant 0 : i32
    return %arg0, %arg1, %c0_i32 : i32, i32, i32
  }
}

</mosaic_0001>

<bundles_post_ra>
// kernel: tpu_custom_call.1
= control target key start
LH: loop header
LB: loop body
LE: loop exit
PB: predicated region body
PF: predicated region fallthrough
CT: control target
= control target key end

     0   :  { %9 = vsyncpa [#allocation3], 0  ;;  %s306_s0 = inlined_call_operand.hbm [shape: f32[8,256], index: 0, kind: input, shape index: {}]   ;;  %s307_s1 = inlined_call_operand.hbm [shape: f32[8,256], index: 1, kind: input, shape index: {}]   ;;  %s308_s2 = inlined_call_operand.hbm [shape: f32[1,8,128], index: 2, kind: output, shape index: {0}]   ;;  %s309_s3 = inlined_call_operand.hbm [shape: f32[1,8,128], index: 3, kind: output, shape index: {1}]  }
   0x1   :  { %10 = vsyncpa [#allocation6], 0 }
   0x2   :  { %11 = vsyncpa [#allocation4], 0 }
   0x3   :  { %12 = vsyncpa [#allocation9], 0  ;;  %s22_s14 = sshll.u32 %s306_s0, 4  ;;  %s270_s15 = smov [#allocation2]   ;;  %s23_s14 = int_to_ptr.hbm [resolvable:$true] %s22_s14 }
   0x4   :  { %s24_s16 = sshll.u32 %s270_s15, 4  ;;  %s37_s19 = sshll.u32 %s307_s1, 4  ;;  %s25_s16 = int_to_ptr.vmem [resolvable:$true] %s24_s16  ;;  %s38_s19 = int_to_ptr.hbm [resolvable:$true] %s37_s19 }
   0x5   :  { %27 = dma.hbm_to_vmem [thread:$0]  %s23_s14, 256, %s25_s16, [#allocation3]  }
   0x6   :  { %s271_s20 = smov [#allocation5]  }
   0x7   :  { %s39_s21 = sshll.u32 %s271_s20, 4  ;;  %s40_s21 = int_to_ptr.vmem [resolvable:$true] %s39_s21 }
   0x8   :  { %42 = dma.hbm_to_vmem [thread:$0]  %s38_s19, 256, %s40_s21, [#allocation6]  }
   0x9   :  { %262 = dma.done.wait [#allocation3], 256  }
   0xa   :  { %263 = vsyncadd [#allocation3], 4294967040 }
   0xb   :  { %264 = dma.done.wait [#allocation6], 256  }
   0xc   :  { %265 = vsyncadd [#allocation6], 4294967040  ;;  %v61_v0 = vld [vmem:[#allocation2] sm:$0xff]  ;;  %v87_v1 = vld [vmem:[#allocation2 + $0x8] sm:$0xff]  ;;  %s272_s0 = smov [#allocation7]   ;;  %s126_s24 = sshll.u32 %s308_s2, 4  ;;  %s127_s24 = int_to_ptr.hbm [resolvable:$true] %s126_s24 }
   0xd   :  { %v63_v2 = vsub.f32 0.0, %v61_v0  ;;  %v90_v3 = vsub.f32 0.0, %v87_v1  ;;  %v62_v25 = vld [vmem:[#allocation5] sm:$0xff]  ;;  %v89_v28 = vld [vmem:[#allocation5 + $0x8] sm:$0xff]  ;;  %s124_s1 = sshll.u32 %s272_s0, 4  ;;  %s273_s25 = smov [#allocation8]   ;;  %s125_s1 = int_to_ptr.vmem [resolvable:$true] %s124_s1 }
   0xe   :  { %s135_s26 = sshll.u32 %s273_s25, 4  ;;  %s137_s29 = sshll.u32 %s309_s3, 4  ;;  %s136_s26 = int_to_ptr.vmem [resolvable:$true] %s135_s26  ;;  %s138_s29 = int_to_ptr.hbm [resolvable:$true] %s137_s29 }
   0xf   :  { %v64_v4 = vmul.f32 1.442695, %v63_v2  ;;  %v91_v5 = vmul.f32 1.442695, %v90_v3 }
  0x11   :  { %158 = vpow2.f32 %v64_v4 }
  0x12   :  { %160 = vpow2.f32 %v91_v5 }
  0x17   :  { %v159_v6 = vpop.eup %158 }
  0x18   :  { %v161_v7 = vpop.eup %160  ;;  %v66_v8 = vadd.f32 1.0, %v159_v6 }
  0x19   :  { %v93_v9 = vadd.f32 1.0, %v161_v7 }
  0x1a   :  { %162 = vrcp.f32 %v66_v8  ;;  %vm72_vm0 = vweird.f32 %v66_v8  ;;  %v78_v13 = vand.u32 2147483648, %v66_v8  ;;  %v76_v16 = vand.u32 2147483647, %v66_v8 }
  0x1b   :  { %164 = vrcp.f32 %v93_v9  ;;  %v105_v17 = vand.u32 2147483648, %v93_v9  ;;  %vm99_vm2 = vweird.f32 %v93_v9  ;;  %v103_v19 = vand.u32 2147483647, %v93_v9 }
  0x1c   :  { %v79_v21 = vor.u32 1.1754944e-38, %v78_v13  ;;  %vm77_vm5 = vcmp.eq.f32.partialorder %v76_v16, 8.507059e+37 }
  0x1d   :  { %v106_v24 = vor.u32 1.1754944e-38, %v105_v17  ;;  %vm104_vm7 = vcmp.eq.f32.partialorder %v103_v19, 8.507059e+37 }
  0x20   :  { %v163_v10 = vpop.eup %162 }
  0x21   :  { %v165_v11 = vpop.eup %164  ;;  %v68_v12 = vmul.f32 %v163_v10, %v66_v8  ;;  %vm73_vm1 = vweird.f32 %v163_v10 }
  0x22   :  { %v95_v14 = vmul.f32 %v165_v11, %v93_v9  ;;  %vm100_vm3 = vweird.f32 %v165_v11  ;;  %vm74_vm4 = vmor %vm72_vm0, %vm73_vm1 }
  0x23   :  { %v69_v15 = vsub.f32 1.0, %v68_v12  ;;  %vm101_vm6 = vmor %vm99_vm2, %vm100_vm3 }
  0x24   :  { %v96_v18 = vsub.f32 1.0, %v95_v14 }
  0x25   :  { %v70_v20 = vmul.f32 %v163_v10, %v69_v15 }
  0x26   :  { %v97_v22 = vmul.f32 %v165_v11, %v96_v18 }
  0x27   :  { %v71_v23 = vadd.f32 %v163_v10, %v70_v20 }
  0x28   :  { %v98_v26 = vadd.f32 %v165_v11, %v97_v22 }
  0x29   :  { %v75_v27 = vsel %vm74_vm4, %v163_v10, %v71_v23 }
  0x2a   :  { %v80_v29 = vsel %vm77_vm5, %v79_v21, %v75_v27  ;;  %v102_v30 = vsel %vm101_vm6, %v165_v11, %v98_v26 }
  0x2b   :  { %v82_v31 = vmul.f32 %v80_v29, %v62_v25  ;;  %v107_v32 = vsel %vm104_vm7, %v106_v24, %v102_v30  ;;  %v84_v33 = vadd.f32 %v80_v29, %v62_v25 }
  0x2c   :  { %v109_v34 = vmul.f32 %v107_v32, %v89_v28  ;;  %v111_v35 = vadd.f32 %v107_v32, %v89_v28 }
  0x2e   :  { %v110_v36 = vadd.f32 %v109_v34, %v82_v31  ;;  %v112_v37 = vadd.f32 %v111_v35, %v84_v33 }
  0x30   :  { %115 = vst [vmem:[#allocation7] sm:$0xff] %v110_v36 }
  0x31   :  { %118 = vst [vmem:[#allocation8] sm:$0xff] %v112_v37  ;;  %129 = dma.vmem_to_hbm [thread:$0]  %s125_s1, 128, %s127_s24, [#allocation4]  }
  0x32   :  { %140 = dma.vmem_to_hbm [thread:$0]  %s136_s26, 128, %s138_s29, [#allocation9]  }
  0x33   :  { %266 = dma.done.wait [#allocation4], 128  }
  0x34   :  { %267 = vsyncadd [#allocation4], 4294967168 }
  0x35   :  { %268 = dma.done.wait [#allocation9], 128  }
  0x36   :  { %269 = vsyncadd [#allocation9], 4294967168 }
  0x37   :  { %149 = vsyncpa [#allocation3], 1 }
  0x38   :  { %150 = vsyncpa [#allocation6], 1 }
  0x39   :  { %151 = vsyncpa [#allocation4], 1 }
  0x3a   :  { %152 = vsyncpa [#allocation9], 1 }

</bundles_post_ra>
